<compile_context>
chip_gen: v7x
topology: tpu7x:2x2x1
jax: 0.10.0
libtpu: 0.0.40
codegen_flags: <defaults>
</compile_context>

<pallas_src>
import jax
import jax.numpy as jnp
import numpy as np
from jax.experimental import pallas as pl
from jax.experimental.pallas import tpu as pltpu


def rnn_fc_kernel(x_ref, wih_ref, whh_ref, b_ref, wfc_ref, bfc_ref, out_ref):
    T, Bt, D_in = x_ref.shape            # static block shape (time-major x tile)
    H = whh_ref.shape[0]

    whh = whh_ref[...]
    mm_dtype = whh.dtype                 # MXU operand dtype (f32 or bf16)

    # ---- Hoisted input projection: one (T*Bt, D_in)@(D_in, H) MXU matmul + bias.
    # Bt is a multiple of the dtype's sublane pack, so this reshape is layout-free.
    x_all = x_ref[...].reshape(T * Bt, D_in)
    xw = (jnp.dot(x_all, wih_ref[...], preferred_element_type=jnp.float32)
          + b_ref[...])                                   # (T*Bt, H), f32, time-major

    # ---- t = 0: h0 @ W_hh is identically zero -> skip the matmul entirely.
    h = jnp.tanh(xw[0:Bt, :])                             # f32

    # ---- Serial tanh recurrence, fully unrolled over small static T.
    # W_hh is loop-invariant; Mosaic can keep the RHS staged in the MXU across steps.
    # TODO(synk): for long T, drive the MXU explicitly (pltpu.matmul_push_rhs /
    # matmul_acc_lhs / matmul_pop) and switch to lax.fori_loop(unroll=4-8) to bound
    # live ranges; unnecessary at T=8.
    for t in range(1, T):
        hw = jnp.dot(h.astype(mm_dtype), whh, preferred_element_type=jnp.float32)
        h = jnp.tanh(xw[t * Bt:(t + 1) * Bt, :] + hw)     # h stays f32

    # ---- Final projection on the last hidden state.
    logits = (jnp.dot(h.astype(mm_dtype), wfc_ref[...],
                      preferred_element_type=jnp.float32)
              + bfc_ref[...])
    out_ref[...] = logits.astype(out_ref.dtype)


def _default_matmul_dtype():
    """bf16 operands by default on v5e (no native f32 MXU path); f32 elsewhere."""
    try:
        kind = jax.devices()[0].device_kind.lower()
    except Exception:
        return jnp.float32
    if ("v5 lite" in kind) or ("v5e" in kind) or ("v5litepod" in kind):
        return jnp.bfloat16
    return jnp.float32


def text_generation_model(x, params, *, matmul_dtype=None, b_tile=None):
    """x: (B, T, input_size) float32, batch_first — same forward as the PyTorch module.

    matmul_dtype: MXU operand dtype (f32 for closest-to-exact semantics, bf16 for
    full-rate MXU; accumulation is always f32).  None -> device-dependent default.
    """
    B, T, D_in = x.shape
    H = params["w_hh"].shape[0]
    D_out = params["w_fc"].shape[0]

    if matmul_dtype is None:
        matmul_dtype = _default_matmul_dtype()
    matmul_dtype = jnp.dtype(matmul_dtype)

    # Sublane pack of the matmul operand dtype -> makes the in-kernel reshape
    # layout-free and per-step xw reads aligned.
    pack = 16 if matmul_dtype == jnp.bfloat16 else 8
    if b_tile is None:
        b_tile = pack
    b_tile = ((max(b_tile, pack) + pack - 1) // pack) * pack
    B_pad = ((B + b_tile - 1) // b_tile) * b_tile

    # Pre-transpose weights so the kernel does plain row-major matmuls.
    wih_t = params["w_ih"].T.astype(matmul_dtype)                       # (D_in, H)
    whh_t = params["w_hh"].T.astype(matmul_dtype)                       # (H, H)
    wfc_t = params["w_fc"].T.astype(matmul_dtype)                       # (H, D_out)
    b_rnn = (params["b_ih"] + params["b_hh"])[None, :].astype(jnp.float32)  # (1, H)
    b_fc = params["b_fc"][None, :].astype(jnp.float32)                  # (1, D_out)

    x_p = x
    if B_pad != B:
        x_p = jnp.pad(x, ((0, B_pad - B), (0, 0), (0, 0)))
    # Time-major: each recurrence step consumes one contiguous (b_tile, H) slab.
    x_tm = jnp.transpose(x_p, (1, 0, 2)).astype(matmul_dtype)           # (T, B_pad, D_in)

    grid = (B_pad // b_tile,)
    inv2 = lambda i: (0, 0)          # loop-invariant weights / biases

    itemsize = matmul_dtype.itemsize
    flops = (2 * B_pad * T * D_in * H          # hoisted input projection
             + 2 * (T - 1) * B_pad * H * H     # recurrence (t=0 skipped)
             + 2 * B_pad * H * D_out)          # final fc
    transcendentals = T * B_pad * H            # tanh
    bytes_accessed = ((T * B_pad * D_in + D_in * H + H * H + H * D_out) * itemsize
                      + (H + D_out) * 4        # biases (f32)
                      + B_pad * D_out * 4)     # output (f32)

    out = pl.pallas_call(
        rnn_fc_kernel,
        out_shape=jax.ShapeDtypeStruct((B_pad, D_out), jnp.float32),
        grid=grid,
        in_specs=[
            pl.BlockSpec((T, b_tile, D_in), lambda i: (0, i, 0)),   # x (time-major tile)
            pl.BlockSpec((D_in, H), inv2),                          # W_ih^T
            pl.BlockSpec((H, H), inv2),                             # W_hh^T
            pl.BlockSpec((1, H), inv2),                             # b_ih + b_hh
            pl.BlockSpec((H, D_out), inv2),                         # W_fc^T
            pl.BlockSpec((1, D_out), inv2),                         # b_fc
        ],
        out_specs=pl.BlockSpec((b_tile, D_out), lambda i: (i, 0)),
        compiler_params=pltpu.CompilerParams(
            dimension_semantics=("parallel",),          # batch grid -> both v7x TCs
            vmem_limit_bytes=32 * 1024 * 1024),         # explicit (v7x: 64 MiB physical)
        cost_estimate=pl.CostEstimate(
            flops=int(flops),
            transcendentals=int(transcendentals),
            bytes_accessed=int(bytes_accessed)),
    )(x_tm, wih_t, whh_t, b_rnn, wfc_t, b_fc)

    return out[:B]


def reference_forward_np(x, params):
    """Host numpy float32 reference of the PyTorch forward (ground truth)."""
    xn = np.asarray(x, np.float32)
    w_ih = np.asarray(params["w_ih"], np.float32)
    w_hh = np.asarray(params["w_hh"], np.float32)
    b_ih = np.asarray(params["b_ih"], np.float32)
    b_hh = np.asarray(params["b_hh"], np.float32)
    w_fc = np.asarray(params["w_fc"], np.float32)
    b_fc = np.asarray(params["b_fc"], np.float32)
    B, T, _ = xn.shape
    H = w_hh.shape[0]
    h = np.zeros((B, H), np.float32)
    for t in range(T):
        h = np.tanh(xn[:, t, :] @ w_ih.T + b_ih + h @ w_hh.T + b_hh)
    return h @ w_fc.T + b_fc


def init_params(key, input_size, hidden_size, output_size):
    ks = jax.random.split(key, 6)
    s = 1.0 / jnp.sqrt(hidden_size)
    return {
        "w_ih": jax.random.uniform(ks[0], (hidden_size, input_size), jnp.float32, -s, s),
        "w_hh": jax.random.uniform(ks[1], (hidden_size, hidden_size), jnp.float32, -s, s),
        "b_ih": jax.random.uniform(ks[2], (hidden_size,), jnp.float32, -s, s),
        "b_hh": jax.random.uniform(ks[3], (hidden_size,), jnp.float32, -s, s),
        "w_fc": jax.random.uniform(ks[4], (output_size, hidden_size), jnp.float32, -s, s),
        "b_fc": jax.random.uniform(ks[5], (output_size,), jnp.float32, -s, s),
    }


if __name__ == "__main__":
    input_size = 256
    output_size = 256
    hidden_size = 128
    B, T = 2, 8

    key = jax.random.PRNGKey(0)
    k_x, k_p = jax.random.split(key)
    x = jax.random.normal(k_x, (B, T, input_size), jnp.float32)
    params = init_params(k_p, input_size, hidden_size, output_size)

    ref = reference_forward_np(x, params)

    # f32-operand path.  Tolerance allows for the MXU's default matmul precision
    # (f32 operands may be lowered to bf16 passes internally).
    out_f32 = jax.block_until_ready(
        text_generation_model(x, params, matmul_dtype=jnp.float32))
    assert out_f32.shape == (B, output_size)
    assert np.allclose(np.asarray(out_f32), ref, atol=3e-2, rtol=3e-2), \
        "f32 path mismatch vs reference"

    # bf16-operand / f32-accumulate path (default on v5e).  Looser tolerance: bf16
    # input/weight quantization compounds through the T-step tanh recurrence.
    out_bf16 = jax.block_until_ready(
        text_generation_model(x, params, matmul_dtype=jnp.bfloat16))
    assert out_bf16.shape == (B, output_size)
    assert np.allclose(np.asarray(out_bf16), ref, atol=6e-2, rtol=6e-2), \
        "bf16 path mismatch vs reference"

    # Device-kind-dependent default (bf16 on v5e, f32 elsewhere).
    out_auto = jax.block_until_ready(text_generation_model(x, params))
    assert out_auto.shape == (B, output_size)

    print("KERNEL_OK")
</pallas_src>

<mosaic_0001>
module attributes {stable_mosaic.version = 11 : i64} {
  func.func @rnn_fc_kernel(%arg0: i32, %arg1: memref<8x8x256xf32, #tpu.memory_space<vmem>>, %arg2: memref<256x128xf32, #tpu.memory_space<vmem>>, %arg3: memref<128x128xf32, #tpu.memory_space<vmem>>, %arg4: memref<1x128xf32, #tpu.memory_space<vmem>>, %arg5: memref<128x256xf32, #tpu.memory_space<vmem>>, %arg6: memref<1x256xf32, #tpu.memory_space<vmem>>, %arg7: memref<8x256xf32, #tpu.memory_space<vmem>>) attributes {dimension_semantics = [#tpu.dimension_semantics<parallel>], iteration_bounds = array<i64: 1>, scalar_prefetch = 0 : i64, scratch_operands = 0 : i64, tpu.core_type = #tpu.core_type<tc>, window_params = [{transform_indices = @transform_0, window_bounds = array<i64: 8, 8, 256>}, {pipeline_mode = #tpu.pipeline_mode<synchronous>, transform_indices = @transform_1, window_bounds = array<i64: 256, 128>}, {pipeline_mode = #tpu.pipeline_mode<synchronous>, transform_indices = @transform_2, window_bounds = array<i64: 128, 128>}, {pipeline_mode = #tpu.pipeline_mode<synchronous>, transform_indices = @transform_3, window_bounds = array<i64: 1, 128>}, {pipeline_mode = #tpu.pipeline_mode<synchronous>, transform_indices = @transform_4, window_bounds = array<i64: 128, 256>}, {pipeline_mode = #tpu.pipeline_mode<synchronous>, transform_indices = @transform_5, window_bounds = array<i64: 1, 256>}, {transform_indices = @transform_6, window_bounds = array<i64: 8, 256>}]} {
    %c0 = arith.constant 0 : index
    %c0_0 = arith.constant 0 : index
    %0 = vector.load %arg3[%c0, %c0_0] : memref<128x128xf32, #tpu.memory_space<vmem>>, vector<128x128xf32>
    %c0_1 = arith.constant 0 : index
    %c0_2 = arith.constant 0 : index
    %c0_3 = arith.constant 0 : index
    %1 = vector.load %arg1[%c0_1, %c0_2, %c0_3] : memref<8x8x256xf32, #tpu.memory_space<vmem>>, vector<8x8x256xf32>
    %2 = vector.shape_cast %1 : vector<8x8x256xf32> to vector<64x256xf32>
    %c0_4 = arith.constant 0 : index
    %c0_5 = arith.constant 0 : index
    %3 = vector.load %arg2[%c0_4, %c0_5] : memref<256x128xf32, #tpu.memory_space<vmem>>, vector<256x128xf32>
    %cst = arith.constant dense<0.000000e+00> : vector<64x128xf32>
    %4 = tpu.matmul %2, %3, %cst {dimension_numbers = #tpu.dot_dimension_numbers<[1], [0], [0], [1], [0, 0, 1, 1], [], []>} : vector<64x256xf32>, vector<256x128xf32>, vector<64x128xf32> -> vector<64x128xf32>
    %c0_6 = arith.constant 0 : index
    %c0_7 = arith.constant 0 : index
    %5 = vector.load %arg4[%c0_6, %c0_7] : memref<1x128xf32, #tpu.memory_space<vmem>>, vector<1x128xf32>
    %6 = vector.broadcast %5 : vector<1x128xf32> to vector<64x128xf32>
    %7 = arith.addf %4, %6 : vector<64x128xf32>
    %8 = vector.extract_strided_slice %7 {offsets = [0, 0], sizes = [8, 128], strides = [1, 1]} : vector<64x128xf32> to vector<8x128xf32>
    %9 = math.tanh %8 : vector<8x128xf32>
    %cst_8 = arith.constant dense<0.000000e+00> : vector<8x128xf32>
    %10 = tpu.matmul %9, %0, %cst_8 {dimension_numbers = #tpu.dot_dimension_numbers<[1], [0], [0], [1], [0, 0, 1, 1], [], []>} : vector<8x128xf32>, vector<128x128xf32>, vector<8x128xf32> -> vector<8x128xf32>
    %11 = vector.extract_strided_slice %7 {offsets = [8, 0], sizes = [8, 128], strides = [1, 1]} : vector<64x128xf32> to vector<8x128xf32>
    %12 = arith.addf %11, %10 : vector<8x128xf32>
    %13 = math.tanh %12 : vector<8x128xf32>
    %cst_9 = arith.constant dense<0.000000e+00> : vector<8x128xf32>
    %14 = tpu.matmul %13, %0, %cst_9 {dimension_numbers = #tpu.dot_dimension_numbers<[1], [0], [0], [1], [0, 0, 1, 1], [], []>} : vector<8x128xf32>, vector<128x128xf32>, vector<8x128xf32> -> vector<8x128xf32>
    %15 = vector.extract_strided_slice %7 {offsets = [16, 0], sizes = [8, 128], strides = [1, 1]} : vector<64x128xf32> to vector<8x128xf32>
    %16 = arith.addf %15, %14 : vector<8x128xf32>
    %17 = math.tanh %16 : vector<8x128xf32>
    %cst_10 = arith.constant dense<0.000000e+00> : vector<8x128xf32>
    %18 = tpu.matmul %17, %0, %cst_10 {dimension_numbers = #tpu.dot_dimension_numbers<[1], [0], [0], [1], [0, 0, 1, 1], [], []>} : vector<8x128xf32>, vector<128x128xf32>, vector<8x128xf32> -> vector<8x128xf32>
    %19 = vector.extract_strided_slice %7 {offsets = [24, 0], sizes = [8, 128], strides = [1, 1]} : vector<64x128xf32> to vector<8x128xf32>
    %20 = arith.addf %19, %18 : vector<8x128xf32>
    %21 = math.tanh %20 : vector<8x128xf32>
    %cst_11 = arith.constant dense<0.000000e+00> : vector<8x128xf32>
    %22 = tpu.matmul %21, %0, %cst_11 {dimension_numbers = #tpu.dot_dimension_numbers<[1], [0], [0], [1], [0, 0, 1, 1], [], []>} : vector<8x128xf32>, vector<128x128xf32>, vector<8x128xf32> -> vector<8x128xf32>
    %23 = vector.extract_strided_slice %7 {offsets = [32, 0], sizes = [8, 128], strides = [1, 1]} : vector<64x128xf32> to vector<8x128xf32>
    %24 = arith.addf %23, %22 : vector<8x128xf32>
    %25 = math.tanh %24 : vector<8x128xf32>
    %cst_12 = arith.constant dense<0.000000e+00> : vector<8x128xf32>
    %26 = tpu.matmul %25, %0, %cst_12 {dimension_numbers = #tpu.dot_dimension_numbers<[1], [0], [0], [1], [0, 0, 1, 1], [], []>} : vector<8x128xf32>, vector<128x128xf32>, vector<8x128xf32> -> vector<8x128xf32>
    %27 = vector.extract_strided_slice %7 {offsets = [40, 0], sizes = [8, 128], strides = [1, 1]} : vector<64x128xf32> to vector<8x128xf32>
    %28 = arith.addf %27, %26 : vector<8x128xf32>
    %29 = math.tanh %28 : vector<8x128xf32>
    %cst_13 = arith.constant dense<0.000000e+00> : vector<8x128xf32>
    %30 = tpu.matmul %29, %0, %cst_13 {dimension_numbers = #tpu.dot_dimension_numbers<[1], [0], [0], [1], [0, 0, 1, 1], [], []>} : vector<8x128xf32>, vector<128x128xf32>, vector<8x128xf32> -> vector<8x128xf32>
    %31 = vector.extract_strided_slice %7 {offsets = [48, 0], sizes = [8, 128], strides = [1, 1]} : vector<64x128xf32> to vector<8x128xf32>
    %32 = arith.addf %31, %30 : vector<8x128xf32>
    %33 = math.tanh %32 : vector<8x128xf32>
    %cst_14 = arith.constant dense<0.000000e+00> : vector<8x128xf32>
    %34 = tpu.matmul %33, %0, %cst_14 {dimension_numbers = #tpu.dot_dimension_numbers<[1], [0], [0], [1], [0, 0, 1, 1], [], []>} : vector<8x128xf32>, vector<128x128xf32>, vector<8x128xf32> -> vector<8x128xf32>
    %35 = vector.extract_strided_slice %7 {offsets = [56, 0], sizes = [8, 128], strides = [1, 1]} : vector<64x128xf32> to vector<8x128xf32>
    %36 = arith.addf %35, %34 : vector<8x128xf32>
    %37 = math.tanh %36 : vector<8x128xf32>
    %c0_15 = arith.constant 0 : index
    %c0_16 = arith.constant 0 : index
    %38 = vector.load %arg5[%c0_15, %c0_16] : memref<128x256xf32, #tpu.memory_space<vmem>>, vector<128x256xf32>
    %cst_17 = arith.constant dense<0.000000e+00> : vector<8x256xf32>
    %39 = tpu.matmul %37, %38, %cst_17 {dimension_numbers = #tpu.dot_dimension_numbers<[1], [0], [0], [1], [0, 0, 1, 1], [], []>} : vector<8x128xf32>, vector<128x256xf32>, vector<8x256xf32> -> vector<8x256xf32>
    %c0_18 = arith.constant 0 : index
    %c0_19 = arith.constant 0 : index
    %40 = vector.load %arg6[%c0_18, %c0_19] : memref<1x256xf32, #tpu.memory_space<vmem>>, vector<1x256xf32>
    %41 = vector.broadcast %40 : vector<1x256xf32> to vector<8x256xf32>
    %42 = arith.addf %39, %41 : vector<8x256xf32>
    %c0_20 = arith.constant 0 : index
    %c0_21 = arith.constant 0 : index
    %43 = vector.load %arg7[%c0_20, %c0_21] : memref<8x256xf32, #tpu.memory_space<vmem>>, vector<8x256xf32>
    tpu.vector_store %arg7[%c0_20, %c0_21], %42 {strides = array<i32>} : memref<8x256xf32, #tpu.memory_space<vmem>>, vector<8x256xf32>,
    return
  }
  func.func @transform_0(%arg0: i32) -> (i32, i32, i32) {
    %c0_i32 = arith.constant 0 : i32
    %c0_i32_0 = arith.constant 0 : i32
    %c0_i32_1 = arith.constant 0 : i32
    return %c0_i32, %arg0, %c0_i32_0 : i32, i32, i32
  }
  func.func @transform_1(%arg0: i32) -> (i32, i32) {
    %c0_i32 = arith.constant 0 : i32
    %c0_i32_0 = arith.constant 0 : i32
    %c0_i32_1 = arith.constant 0 : i32
    return %c0_i32, %c0_i32_0 : i32, i32
  }
  func.func @transform_2(%arg0: i32) -> (i32, i32) {
    %c0_i32 = arith.constant 0 : i32
    %c0_i32_0 = arith.constant 0 : i32
    %c0_i32_1 = arith.constant 0 : i32
    return %c0_i32, %c0_i32_0 : i32, i32
  }
  func.func @transform_3(%arg0: i32) -> (i32, i32) {
    %c0_i32 = arith.constant 0 : i32
    %c0_i32_0 = arith.constant 0 : i32
    %c0_i32_1 = arith.constant 0 : i32
    return %c0_i32, %c0_i32_0 : i32, i32
  }
  func.func @transform_4(%arg0: i32) -> (i32, i32) {
    %c0_i32 = arith.constant 0 : i32
    %c0_i32_0 = arith.constant 0 : i32
    %c0_i32_1 = arith.constant 0 : i32
    return %c0_i32, %c0_i32_0 : i32, i32
  }
  func.func @transform_5(%arg0: i32) -> (i32, i32) {
    %c0_i32 = arith.constant 0 : i32
    %c0_i32_0 = arith.constant 0 : i32
    %c0_i32_1 = arith.constant 0 : i32
    return %c0_i32, %c0_i32_0 : i32, i32
  }
  func.func @transform_6(%arg0: i32) -> (i32, i32) {
    %c0_i32 = arith.constant 0 : i32
    %c0_i32_0 = arith.constant 0 : i32
    return %arg0, %c0_i32 : i32, i32
  }
}

</mosaic_0001>

<bundles_post_ra>
// kernel: tpu_custom_call.1
= control target key start
LH: loop header
LB: loop body
LE: loop exit
PB: predicated region body
PF: predicated region fallthrough
CT: control target
= control target key end

     0   :  { %11 = vsyncpa [#allocation3], 0  ;;  %s1990_s0 = inlined_call_operand.hbm [shape: f32[8,8,256], index: 0, kind: input, shape index: {}]   ;;  %s1991_s1 = inlined_call_operand.hbm [shape: f32[256,128], index: 1, kind: input, shape index: {}]   ;;  %s1992_s2 = inlined_call_operand.hbm [shape: f32[128,128], index: 2, kind: input, shape index: {}]   ;;  %s1993_s3 = inlined_call_operand.vmem [shape: f32[1,128], index: 3, kind: input, shape index: {}]   ;;  %s1994_s4 = inlined_call_operand.hbm [shape: f32[128,256], index: 4, kind: input, shape index: {}]   ;;  %s1995_s5 = inlined_call_operand.vmem [shape: f32[1,256], index: 5, kind: input, shape index: {}]   ;;  %s1996_s6 = inlined_call_operand.hbm [shape: f32[8,256], index: 6, kind: output, shape index: {}]  }
   0x1   :  { %12 = vsyncpa [#allocation6], 0 }
   0x2   :  { %13 = vsyncpa [#allocation9], 0 }
   0x3   :  { %14 = vsyncpa [#allocation4], 0  ;;  %s1693_s21 = smov [#allocation5]   ;;  %s1575_s25 = scalar_lea.hbm %s1991_s1, 4096 }
   0x4   :  { %s32_s22 = sshll.u32 %s1693_s21, 4  ;;  %p1576_p0 = scmp.ne.s32.totalorder %s1991_s1, %s1575_s25  ;;  %s33_s22 = int_to_ptr.vmem [resolvable:$true] %s32_s22 }
   0x5   :  { %p1579_p1 = scmp.lt.u32.totalorder %s1575_s25, %s1991_s1 }
   0x7   :  { %p1581_p2 = pnand %p1579_p1, %p1576_p0 }
   0x9   :  { %1584 = shalt.err (!%p1581_p2)
}
   0xa   :  { %s1585_s30 = scalar_lea.vmem %s33_s22, 4096  ;;  %p1590_p4 = scmp.lt.s32.totalorder %s33_s22, %s33_s22 }
   0xb   :  { %p1586_p3 = scmp.ne.s32.totalorder %s33_s22, %s1585_s30  ;;  %p1591_p5 = scmp.lt.s32.totalorder %s1585_s30, %s1585_s30 }
   0xd   :  { %p1592_p6 = por %p1591_p5, %p1590_p4 }
   0xf   :  { %p1593_p7 = pnand %p1592_p6, %p1586_p3 }
  0x11   :  { %1596 = shalt.err (!%p1593_p7)
}
  0x12   :  { %s1694_s7 = smov 128   ;;  %s1695_s8 = smov 8  }
  0x13   :  { %38 = dma.hbm_to_vmem [thread:$0]  %s1991_s1, 4096, %s33_s22, [#allocation6], %s1694_s7, %s1694_s7, %s1695_s8  }
  0x14   :  { %s1696_s11 = smov [#allocation2]   ;;  %s1597_s15 = scalar_lea.hbm %s1990_s0, 2048 }
  0x15   :  { %s20_s12 = sshll.u32 %s1696_s11, 4  ;;  %p1598_p8 = scmp.ne.s32.totalorder %s1990_s0, %s1597_s15  ;;  %s21_s12 = int_to_ptr.vmem [resolvable:$true] %s20_s12 }
  0x16   :  { %p1601_p9 = scmp.lt.u32.totalorder %s1597_s15, %s1990_s0 }
  0x18   :  { %p1603_p10 = pnand %p1601_p9, %p1598_p8 }
  0x1a   :  { %1606 = shalt.err (!%p1603_p10)
}
  0x1b   :  { %s1607_s20 = scalar_lea.vmem %s21_s12, 2048  ;;  %p1612_p12 = scmp.lt.s32.totalorder %s21_s12, %s21_s12 }
  0x1c   :  { %p1608_p11 = scmp.ne.s32.totalorder %s21_s12, %s1607_s20  ;;  %p1613_p13 = scmp.lt.s32.totalorder %s1607_s20, %s1607_s20 }
  0x1e   :  { %p1614_p0 = por %p1613_p13, %p1612_p12 }
  0x20   :  { %p1615_p1 = pnand %p1614_p0, %p1608_p11 }
  0x22   :  { %1618 = shalt.err (!%p1615_p1)
}
  0x23   :  { %s1697_s1 = smov 256   ;;  %s1698_s21 = smov 16  }
  0x24   :  { %26 = dma.hbm_to_vmem [thread:$0]  %s1990_s0, 2048, %s21_s12, [#allocation3], %s1697_s1, %s1697_s1, %s1698_s21  }
  0x25   :  { %s1699_s24 = smov [#allocation7]   ;;  %s1700_s26 = smov [#allocation8]  }
  0x26   :  { %s44_s25 = sshll.u32 %s1699_s24, 4  ;;  %s58_s27 = sshll.u32 %s1700_s26, 4  ;;  %s45_s25 = int_to_ptr.vmem [resolvable:$true] %s44_s25  ;;  %s1770_s27 = int_to_ptr.vmem [resolvable:$true] %s58_s27 }
  0x27   :  { %s1619_s30 = scalar_lea.hbm %s1992_s2, 2048 }
  0x28   :  { %p1620_p2 = scmp.ne.s32.totalorder %s1992_s2, %s1619_s30  ;;  %p1623_p3 = scmp.lt.u32.totalorder %s1619_s30, %s1992_s2 }
  0x2a   :  { %p1625_p4 = pnand %p1623_p3, %p1620_p2 }
  0x2c   :  { %1628 = shalt.err (!%p1625_p4)
}
  0x2d   :  { %s1629_s0 = scalar_lea.vmem %s45_s25, 2048  ;;  %p1634_p6 = scmp.lt.s32.totalorder %s45_s25, %s45_s25 }
  0x2e   :  { %p1630_p5 = scmp.ne.s32.totalorder %s45_s25, %s1629_s0  ;;  %p1635_p7 = scmp.lt.s32.totalorder %s1629_s0, %s1629_s0 }
  0x30   :  { %p1636_p8 = por %p1635_p7, %p1634_p6 }
  0x32   :  { %p1637_p9 = pnand %p1636_p8, %p1630_p5 }
  0x34   :  { %1640 = shalt.err (!%p1637_p9)
}
  0x35   :  { %50 = dma.hbm_to_vmem [thread:$0]  %s1992_s2, 2048, %s45_s25, [#allocation6], %s1694_s7, %s1694_s7, %s1695_s8  }
  0x36   :  { %s1641_s17 = scalar_lea.hbm %s1994_s4, 4096 }
  0x37   :  { %p1642_p10 = scmp.ne.s32.totalorder %s1994_s4, %s1641_s17  ;;  %p1645_p11 = scmp.lt.u32.totalorder %s1641_s17, %s1994_s4 }
  0x39   :  { %p1647_p12 = pnand %p1645_p11, %p1642_p10 }
  0x3b   :  { %1650 = shalt.err (!%p1647_p12)
}
  0x3c   :  { %s1651_s23 = scalar_lea.vmem %s1770_s27, 4096  ;;  %p1656_p0 = scmp.lt.s32.totalorder %s1770_s27, %s1770_s27 }
  0x3d   :  { %p1652_p13 = scmp.ne.s32.totalorder %s1770_s27, %s1651_s23  ;;  %p1657_p1 = scmp.lt.s32.totalorder %s1651_s23, %s1651_s23 }
  0x3f   :  { %p1658_p2 = por %p1657_p1, %p1656_p0 }
  0x41   :  { %p1659_p3 = pnand %p1658_p2, %p1652_p13 }
  0x43   :  { %1662 = shalt.err (!%p1659_p3)
}
  0x44   :  { %64 = dma.hbm_to_vmem [thread:$0]  %s1994_s4, 4096, %s1770_s27, [#allocation9], %s1697_s1, %s1697_s1, %s1698_s21  }
  0x45   :  { %1685 = dma.done.wait [#allocation3], 2048  }
  0x46   :  { %1686 = vsyncadd [#allocation3], 4294965248 }
  0x47   :  { %1687 = dma.done.wait [#allocation6], 6144  }
  0x48   :  { %1688 = vsyncadd [#allocation6], 4294961152 }
  0x49   :  { %1689 = dma.done.wait [#allocation9], 4096  }
  0x4a   :  { %1690 = vsyncadd [#allocation9], 4294963200  ;;  %v1701_v0 = vmov 0.0|0.0   ;;  %v127_v1 = vld [vmem:[#allocation5 + $0x80] sm:$0xff]  ;;  %v128_v2 = vld [vmem:[#allocation5 + $0x88] sm:$0xff]  ;;  %vm1702_vm0 = vmmov 0  }
  0x4b   :  { %1347 = vmatprep.subr.bf16.mxu1 %v1701_v0  ;;  %v111_v3 = vld [vmem:[#allocation5] sm:$0xff]  ;;  %v1315_v4 = vpack.c.bf16 %v128_v2, %v127_v1  ;;  %v112_v5 = vld [vmem:[#allocation5 + $0x8] sm:$0xff]  ;;  %v129_v6 = vld [vmem:[#allocation5 + $0x90] sm:$0xff]  ;;  %s1704_s21 = smov [#allocation10]  }
  0x4c   :  { %v130_v7 = vld [vmem:[#allocation5 + $0x98] sm:$0xff]  ;;  %v1317_v8 = vpack.c.bf16 %v112_v5, %v111_v3  ;;  %v113_v10 = vld [vmem:[#allocation5 + $0x10] sm:$0xff]  ;;  %v131_v12 = vld [vmem:[#allocation5 + $0xa0] sm:$0xff]  ;;  %s883_s24 = sshll.u32 %s1704_s21, 4  ;;  %s884_s24 = int_to_ptr.vmem [resolvable:$true] %s883_s24 }
  0x4d   :  { %v1319_v9 = vpack.c.bf16 %v130_v7, %v129_v6  ;;  %v114_v11 = vld [vmem:[#allocation5 + $0x18] sm:$0xff]  ;;  %1316 = vmatprep.subr.bf16.mxu0 %v1315_v4  ;;  %v132_v13 = vld [vmem:[#allocation5 + $0xa8] sm:$0xff]  ;;  %v115_v16 = vld [vmem:[#allocation5 + $0x20] sm:$0xff]  ;;  %s1663_s25 = scalar_lea.vmem %s884_s24, 256  ;;  %p1668_p5 = scmp.lt.s32.totalorder %s884_s24, %s884_s24 }
  0x4e   :  { %1318 = vmatpush3.bf16.msra.mxu0 %v1317_v8  ;;  %v1321_v14 = vpack.c.bf16 %v114_v11, %v113_v10  ;;  %v1323_v15 = vpack.c.bf16 %v132_v13, %v131_v12  ;;  %v116_v17 = vld [vmem:[#allocation5 + $0x28] sm:$0xff]  ;;  %v133_v18 = vld [vmem:[#allocation5 + $0xb0] sm:$0xff]  ;;  %v134_v19 = vld [vmem:[#allocation5 + $0xb8] sm:$0xff]  ;;  %v1703_v13 = vmov 0.0   ;;  %p1664_p4 = scmp.ne.s32.totalorder %s884_s24, %s1663_s25  ;;  %p1669_p6 = scmp.lt.s32.totalorder %s1663_s25, %s1663_s25 }
  0x4f   :  { %1320 = vmatprep.subr.bf16.mxu0 %v1319_v9  ;;  %v1325_v20 = vpack.c.bf16 %v116_v17, %v115_v16  ;;  %v1327_v21 = vpack.c.bf16 %v134_v19, %v133_v18  ;;  %v117_v22 = vld [vmem:[#allocation5 + $0x30] sm:$0xff]  ;;  %v118_v23 = vld [vmem:[#allocation5 + $0x38] sm:$0xff]  ;;  %v135_v24 = vld [vmem:[#allocation5 + $0xc0] sm:$0xff]  ;;  %1102 = vmatprep.mubr.msk.f32.mxu1 %vm1702_vm0, %v1703_v13 }
  0x50   :  { %v136_v25 = vld [vmem:[#allocation5 + $0xc8] sm:$0xff]  ;;  %v79_v27 = vld [vmem:[#allocation7] sm:$0xff]  ;;  %v1329_v29 = vpack.c.bf16 %v118_v23, %v117_v22  ;;  %v81_v31 = vld [vmem:[#allocation7 + $0x10] sm:$0xff]  ;;  %p1670_p7 = por %p1669_p6, %p1668_p5 }
  0x51   :  { %v96_v26 = vld [vmem:[#allocation2 + $0x8] sm:$0xff]  ;;  %v82_v32 = vld [vmem:[#allocation7 + $0x18] sm:$0xff]  ;;  %v1331_v33 = vpack.c.bf16 %v136_v25, %v135_v24  ;;  %v119_v34 = vld [vmem:[#allocation5 + $0x40] sm:$0xff] }
  0x52   :  { %1322 = vmatpush3.bf16.msra.mxu0 %v1321_v14  ;;  %214 = vmatprep.mubr.f32.mxu0 %v96_v26  ;;  %v80_v28 = vld [vmem:[#allocation7 + $0x8] sm:$0xff]  ;;  %v137_v36 = vld [vmem:[#allocation5 + $0xd0] sm:$0xff]  ;;  %v138_v37 = vld [vmem:[#allocation5 + $0xd8] sm:$0xff]  ;;  %v1811_v38 = vpack.c.bf16 %v82_v32, %v81_v31  ;;  %p1671_p8 = pnand %p1670_p7, %p1664_p4 }
  0x53   :  { %1324 = vmatprep.subr.bf16.mxu0 %v1323_v15  ;;  %v1808_v30 = vpack.c.bf16 %v80_v28, %v79_v27  ;;  %v120_v35 = vld [vmem:[#allocation5 + $0x48] sm:$0xff]  ;;  %v83_v39 = vld [vmem:[#allocation7 + $0x20] sm:$0xff]  ;;  %v1335_v42 = vpack.c.bf16 %v138_v37, %v137_v36  ;;  %v121_v43 = vld [vmem:[#allocation5 + $0x50] sm:$0xff] }
  0x54   :  { %v84_v40 = vld [vmem:[#allocation7 + $0x28] sm:$0xff]  ;;  %v1333_v41 = vpack.c.bf16 %v120_v35, %v119_v34  ;;  %v122_v44 = vld [vmem:[#allocation5 + $0x58] sm:$0xff]  ;;  %v139_v45 = vld [vmem:[#allocation5 + $0xe0] sm:$0xff] }
  0x55   :  { %1349 = vmatpush3.bf16.msra.mxu1 %v1808_v30  ;;  %v140_v46 = vld [vmem:[#allocation5 + $0xe8] sm:$0xff]  ;;  %v1815_v47 = vpack.c.bf16 %v84_v40, %v83_v39  ;;  %v85_v48 = vld [vmem:[#allocation7 + $0x30] sm:$0xff]  ;;  %v86_v49 = vld [vmem:[#allocation7 + $0x38] sm:$0xff]  ;;  %v1337_v50 = vpack.c.bf16 %v122_v44, %v121_v43 }
  0x56   :  { %1326 = vmatpush3.bf16.msra.mxu0 %v1325_v20  ;;  %1350 = vmatprep.subr.bf16.mxu1 %v1701_v0  ;;  %v1339_v51 = vpack.c.bf16 %v140_v46, %v139_v45  ;;  %v123_v52 = vld [vmem:[#allocation5 + $0x60] sm:$0xff]  ;;  %v124_v53 = vld [vmem:[#allocation5 + $0x68] sm:$0xff]  ;;  %v141_v54 = vld [vmem:[#allocation5 + $0xf0] sm:$0xff]  ;;  %v1819_v56 = vpack.c.bf16 %v86_v49, %v85_v48 }
  0x57   :  { %1328 = vmatprep.subr.bf16.mxu0 %v1327_v21  ;;  %v142_v55 = vld [vmem:[#allocation5 + $0xf8] sm:$0xff]  ;;  %v1341_v57 = vpack.c.bf16 %v124_v53, %v123_v52  ;;  %v125_v59 = vld [vmem:[#allocation5 + $0x70] sm:$0xff]  ;;  %v95_v62 = vld [vmem:[#allocation2] sm:$0xff] }
  0x58   :  { %v1343_v58 = vpack.c.bf16 %v142_v55, %v141_v54  ;;  %v126_v60 = vld [vmem:[#allocation5 + $0x78] sm:$0xff]  ;;  %v87_v63 = vld [vmem:[#allocation7 + $0x40] sm:$0xff]  ;;  %v88_v1 = vld [vmem:[#allocation7 + $0x48] sm:$0xff] }
  0x59   :  { %1352 = vmatpush3.bf16.msra.mxu1 %v1811_v38  ;;  %v1345_v61 = vpack.c.bf16 %v126_v60, %v125_v59  ;;  %v1833_v2 = vpack.c.bf16 %v88_v1, %v87_v63  ;;  %v89_v3 = vld [vmem:[#allocation7 + $0x50] sm:$0xff]  ;;  %v90_v4 = vld [vmem:[#allocation7 + $0x58] sm:$0xff]  ;;  %v91_v7 = vld [vmem:[#allocation7 + $0x60] sm:$0xff] }
  0x5a   :  { %1330 = vmatpush3.bf16.msra.mxu0 %v1329_v29  ;;  %1353 = vmatprep.subr.bf16.mxu1 %v1701_v0  ;;  %v1839_v5 = vpack.c.bf16 %v90_v4, %v89_v3  ;;  %v98_v6 = vld [vmem:[#allocation2 + $0x18] sm:$0xff]  ;;  %v92_v8 = vld [vmem:[#allocation7 + $0x68] sm:$0xff]  ;;  %v97_v10 = vld [vmem:[#allocation2 + $0x10] sm:$0xff] }
  0x5b   :  { %1332 = vmatprep.subr.bf16.mxu0 %v1331_v33  ;;  %v1844_v9 = vpack.c.bf16 %v92_v8, %v91_v7  ;;  %v93_v11 = vld [vmem:[#allocation7 + $0x70] sm:$0xff]  ;;  %v94_v12 = vld [vmem:[#allocation7 + $0x78] sm:$0xff]  ;;  %v100_v15 = vld [vmem:[#allocation2 + $0x28] sm:$0xff] }
  0x5c   :  { %v1850_v14 = vpack.c.bf16 %v94_v12, %v93_v11  ;;  %v99_v16 = vld [vmem:[#allocation2 + $0x20] sm:$0xff]  ;;  %v102_v17 = vld [vmem:[#allocation2 + $0x38] sm:$0xff]  ;;  %v101_v18 = vld [vmem:[#allocation2 + $0x30] sm:$0xff] }
  0x5d   :  { %1355 = vmatpush3.bf16.msra.mxu1 %v1815_v47  ;;  %v104_v19 = vld [vmem:[#allocation2 + $0x48] sm:$0xff]  ;;  %v103_v20 = vld [vmem:[#allocation2 + $0x40] sm:$0xff]  ;;  %v106_v21 = vld [vmem:[#allocation2 + $0x58] sm:$0xff] }
  0x5e   :  { %1334 = vmatpush3.bf16.msra.mxu0 %v1333_v41  ;;  %1356 = vmatprep.subr.bf16.mxu1 %v1701_v0  ;;  %v1862_v23 = vld [vmem:[%s1993_s3] ss:$0 sm:$0xff]  ;;  %v105_v32 = vld [vmem:[#allocation2 + $0x50] sm:$0xff]  ;;  %v108_v33 = vld [vmem:[#allocation2 + $0x68] sm:$0xff] }
  0x5f   :  { %1336 = vmatprep.subr.bf16.mxu0 %v1335_v42  ;;  %v107_v34 = vld [vmem:[#allocation2 + $0x60] sm:$0xff]  ;;  %v110_v35 = vld [vmem:[#allocation2 + $0x78] sm:$0xff]  ;;  %v109_v36 = vld [vmem:[#allocation2 + $0x70] sm:$0xff] }
  0x61   :  { %1358 = vmatpush3.bf16.msra.mxu1 %v1819_v56 }
  0x62   :  { %1338 = vmatpush3.bf16.msra.mxu0 %v1337_v50  ;;  %1359 = vmatprep.subr.bf16.mxu1 %v1701_v0 }
  0x63   :  { %1340 = vmatprep.subr.bf16.mxu0 %v1339_v51 }
  0x65   :  { %1361 = vmatpush3.bf16.msra.mxu1 %v1833_v2 }
  0x66   :  { %1342 = vmatpush3.bf16.msra.mxu0 %v1341_v57  ;;  %1362 = vmatprep.subr.bf16.mxu1 %v1701_v0 }
  0x67   :  { %1344 = vmatprep.subr.bf16.mxu0 %v1343_v58 }
  0x69   :  { %1364 = vmatpush3.bf16.msra.mxu1 %v1839_v5 }
  0x6a   :  { %1346 = vmatpush3.bf16.msra.mxu0 %v1345_v61  ;;  %1365 = vmatprep.subr.bf16.mxu1 %v1701_v0 }
  0x6b   :  { %1371 = vmatprep.subr.bf16.mxu0 %v1701_v0 }
  0x6d   :  { %215 = vmatmul.mubr.f32.vlgmr.msra.gmra.mrb[0].mxu0 %v95_v62  ;;  %1367 = vmatpush3.bf16.msra.mxu1 %v1844_v9 }
  0x6e   :  { %1373 = vmatpush3.bf16.msra.mxu0 %v1808_v30  ;;  %219 = vmatprep.mubr.f32.mxu0 %v98_v6 }
  0x6f   :  { %1374 = vmatprep.subr.bf16.mxu0 %v1701_v0  ;;  %1368 = vmatprep.subr.bf16.mxu1 %v1701_v0 }
  0x71   :  { %220 = vmatmul.mubr.f32.gmra.mrb[2].mxu0 %v97_v10  ;;  %1370 = vmatpush3.bf16.msra.mxu1 %v1850_v14 }
  0x72   :  { %1376 = vmatpush3.bf16.msra.mxu0 %v1811_v38  ;;  %1395 = vmatprep.subr.bf16.mxu1 %v1701_v0 }
  0x73   :  { %1377 = vmatprep.subr.bf16.mxu0 %v1701_v0  ;;  %224 = vmatprep.mubr.f32.mxu0 %v100_v15 }
  0x75   :  { %225 = vmatmul.mubr.f32.gmra.mrb[4].mxu0 %v99_v16 }
  0x76   :  { %1379 = vmatpush3.bf16.msra.mxu0 %v1815_v47  ;;  %229 = vmatprep.mubr.f32.mxu0 %v102_v17 }
  0x77   :  { %1380 = vmatprep.subr.bf16.mxu0 %v1701_v0 }
  0x79   :  { %230 = vmatmul.mubr.f32.gmra.mrb[6].mxu0 %v101_v18 }
  0x7a   :  { %1382 = vmatpush3.bf16.msra.mxu0 %v1819_v56  ;;  %234 = vmatprep.mubr.f32.mxu0 %v104_v19 }
  0x7b   :  { %1383 = vmatprep.subr.bf16.mxu0 %v1701_v0 }
  0x7d   :  { %235 = vmatmul.mubr.f32.gmra.mrb[8].mxu0 %v103_v20  ;;  %v763_v20 = vld [vmem:[#allocation8 + $0x18] sm:$0xff] }
  0x7e   :  { %1385 = vmatpush3.bf16.msra.mxu0 %v1833_v2  ;;  %239 = vmatprep.mubr.f32.mxu0 %v106_v21  ;;  %v760_v21 = vld [vmem:[#allocation8] sm:$0xff] }
  0x7f   :  { %1386 = vmatprep.subr.bf16.mxu0 %v1701_v0 }
  0x81   :  { %240 = vmatmul.mubr.f32.gmra.mrb[10].mxu0 %v105_v32 }
  0x82   :  { %1388 = vmatpush3.bf16.msra.mxu0 %v1839_v5  ;;  %244 = vmatprep.mubr.f32.mxu0 %v108_v33  ;;  %v768_v33 = vld [vmem:[#allocation8 + $0x40] sm:$0xff] }
  0x83   :  { %1389 = vmatprep.subr.bf16.mxu0 %v1701_v0 }
  0x85   :  { %245 = vmatmul.mubr.f32.gmra.mrb[12].mxu0 %v107_v34  ;;  %v773_v34 = vld [vmem:[#allocation8 + $0x68] sm:$0xff] }
  0x86   :  { %1391 = vmatpush3.bf16.msra.mxu0 %v1844_v9  ;;  %249 = vmatprep.mubr.f32.mxu0 %v110_v35  ;;  %v775_v35 = vld [vmem:[#allocation8 + $0x78] sm:$0xff] }
  0x87   :  { %1392 = vmatprep.subr.bf16.mxu0 %v1701_v0 }
  0x89   :  { %250 = vmatmul.mubr.f32.gmra.mrb[14].mxu0 %v109_v36 }
  0x8a   :  { %1394 = vmatpush3.bf16.msra.mxu0 %v1850_v14  ;;  %1137 = vmatprep.mubr.msk.f32.mxu0 %vm1702_vm0, %v1703_v13 }
  0x8b   :  { %1419 = vmatprep.subr.bf16.mxu0 %v1701_v0 }
 0x140   :  { %v927_v22 = vpop.f32.mrb[0].mxu0 }
 0x141   :  { %v928_v24 = vpop.f32.mrb[1].mxu0 }
 0x142   :  { %v929_v25 = vadd.f32 %v928_v24, %v927_v22  ;;  %v765_v24 = vld [vmem:[#allocation8 + $0x28] sm:$0xff] }
 0x144   :  { %v217_v26 = vadd.f32 %v929_v25, %v1862_v23  ;;  %v930_v28 = vpop.f32.mrb[2].mxu0 }
 0x145   :  { %v931_v29 = vpop.f32.mrb[3].mxu0 }
 0x146   :  { %1559 = vtanh.f32 %v217_v26  ;;  %v932_v31 = vadd.f32 %v931_v29, %v930_v28  ;;  %v764_v26 = vld [vmem:[#allocation8 + $0x20] sm:$0xff]  ;;  %v769_v28 = vld [vmem:[#allocation8 + $0x48] sm:$0xff]  ;;  %v771_v29 = vld [vmem:[#allocation8 + $0x58] sm:$0xff] }
 0x147   :  { %v1523_v32 = vpack.c.bf16 %v771_v29, %v769_v28 }
 0x148   :  { %v933_v37 = vpop.f32.mrb[4].mxu0  ;;  %v222_v48 = vadd.f32 %v932_v31, %v1862_v23 }
 0x149   :  { %v934_v39 = vpop.f32.mrb[5].mxu0 }
 0x14a   :  { %v935_v40 = vadd.f32 %v934_v39, %v933_v37  ;;  %v1527_v37 = vpack.c.bf16 %v775_v35, %v773_v34  ;;  %v772_v39 = vld [vmem:[#allocation8 + $0x60] sm:$0xff] }
 0x14c   :  { %v936_v41 = vpop.f32.mrb[6].mxu0  ;;  %v227_v63 = vadd.f32 %v935_v40, %v1862_v23  ;;  %v774_v40 = vld [vmem:[#allocation8 + $0x70] sm:$0xff] }
 0x14d   :  { %v937_v42 = vpop.f32.mrb[7].mxu0 }
 0x14e   :  { %v938_v43 = vadd.f32 %v937_v42, %v936_v41  ;;  %v777_v41 = vld [vmem:[#allocation8 + $0x88] sm:$0xff]  ;;  %v779_v42 = vld [vmem:[#allocation8 + $0x98] sm:$0xff] }
 0x150   :  { %v1560_v27 = vpop.eup %1559  ;;  %v939_v44 = vpop.f32.mrb[8].mxu0  ;;  %v232_v7 = vadd.f32 %v938_v43, %v1862_v23  ;;  %v1529_v43 = vpack.c.bf16 %v774_v40, %v772_v39 }
 0x151   :  { %1103 = vmatmul.mubr.f32.vlgmr.msra.gmra.mrb[0].mxu1 %v1560_v27  ;;  %v940_v45 = vpop.f32.mrb[9].mxu0  ;;  %v766_v27 = vld [vmem:[#allocation8 + $0x30] sm:$0xff] }
 0x152   :  { %1397 = vmatpush3.bf16.msra.mxu1 %v1808_v30  ;;  %1172 = vmatprep.mubr.msk.f32.mxu1 %vm1702_vm0, %v1703_v13  ;;  %v1885_v46 = vadd.f32 %v940_v45, %v939_v44  ;;  %v1521_v31 = vpack.c.bf16 %v766_v27, %v764_v26  ;;  %v1531_v44 = vpack.c.bf16 %v779_v42, %v777_v41  ;;  %v776_v45 = vld [vmem:[#allocation8 + $0x80] sm:$0xff] }
 0x153   :  { %1398 = vmatprep.subr.bf16.mxu1 %v1701_v0 }
 0x154   :  { %v942_v53 = vpop.f32.mrb[10].mxu0  ;;  %v237_v15 = vadd.f32 %v1885_v46, %v1862_v23  ;;  %v778_v46 = vld [vmem:[#allocation8 + $0x90] sm:$0xff] }
 0x155   :  { %v943_v54 = vpop.f32.mrb[11].mxu0 }
 0x156   :  { %1400 = vmatpush3.bf16.msra.mxu1 %v1811_v38  ;;  %v1906_v55 = vadd.f32 %v943_v54, %v942_v53  ;;  %v781_v54 = vld [vmem:[#allocation8 + $0xa8] sm:$0xff] }
 0x157   :  { %1401 = vmatprep.subr.bf16.mxu1 %v1701_v0 }
 0x158   :  { %v945_v57 = vpop.f32.mrb[12].mxu0 }
 0x159   :  { %v946_v58 = vpop.f32.mrb[13].mxu0 }
 0x15a   :  { %1403 = vmatpush3.bf16.msra.mxu1 %v1815_v47  ;;  %v1908_v59 = vadd.f32 %v946_v58, %v945_v57  ;;  %v780_v58 = vld [vmem:[#allocation8 + $0xa0] sm:$0xff] }
 0x15b   :  { %1404 = vmatprep.subr.bf16.mxu1 %v1701_v0 }
 0x15c   :  { %v948_v60 = vpop.f32.mrb[14].mxu0 }
 0x15d   :  { %v949_v61 = vpop.f32.mrb[15].mxu0 }
 0x15e   :  { %1406 = vmatpush3.bf16.msra.mxu1 %v1819_v56  ;;  %v1910_v62 = vadd.f32 %v949_v61, %v948_v60  ;;  %v782_v60 = vld [vmem:[#allocation8 + $0xb0] sm:$0xff] }
 0x15f   :  { %1407 = vmatprep.subr.bf16.mxu1 %v1701_v0  ;;  %v1537_v61 = vpack.c.bf16 %v782_v60, %v780_v58 }
 0x162   :  { %1409 = vmatpush3.bf16.msra.mxu1 %v1833_v2 }
 0x163   :  { %1410 = vmatprep.subr.bf16.mxu1 %v1701_v0 }
 0x166   :  { %1412 = vmatpush3.bf16.msra.mxu1 %v1839_v5 }
 0x167   :  { %1413 = vmatprep.subr.bf16.mxu1 %v1701_v0 }
 0x16a   :  { %1415 = vmatpush3.bf16.msra.mxu1 %v1844_v9 }
 0x16b   :  { %1416 = vmatprep.subr.bf16.mxu1 %v1701_v0 }
 0x16e   :  { %1418 = vmatpush3.bf16.msra.mxu1 %v1850_v14 }
 0x16f   :  { %1443 = vmatprep.subr.bf16.mxu1 %v1701_v0 }
 0x224   :  { %v322_v49 = vpop.f32.mrb[0].mxu1 }
 0x225   :  { %v326_v50 = vadd.f32 %v322_v49, %v222_v48  ;;  %v1104_v51 = vpop.f32.mrb[1].mxu1  ;;  %v1533_v48 = vpack.c.bf16 %v778_v46, %v776_v45  ;;  %v247_v49 = vadd.f32 %v1908_v59, %v1862_v23  ;;  %v789_v59 = vld [vmem:[#allocation8 + $0xe8] sm:$0xff] }
 0x227   :  { %1561 = vtanh.f32 %v326_v50 }
 0x231   :  { %v1562_v52 = vpop.eup %1561 }
 0x232   :  { %1138 = vmatmul.mubr.f32.vlgmr.msra.gmra.mrb[16].mxu0 %v1562_v52 }
 0x233   :  { %1421 = vmatpush3.bf16.msra.mxu0 %v1808_v30  ;;  %1207 = vmatprep.mubr.msk.f32.mxu0 %vm1702_vm0, %v1703_v13 }
 0x234   :  { %1422 = vmatprep.subr.bf16.mxu0 %v1701_v0 }
 0x237   :  { %1424 = vmatpush3.bf16.msra.mxu0 %v1811_v38 }
 0x238   :  { %1425 = vmatprep.subr.bf16.mxu0 %v1701_v0 }
 0x23b   :  { %1427 = vmatpush3.bf16.msra.mxu0 %v1815_v47 }
 0x23c   :  { %1428 = vmatprep.subr.bf16.mxu0 %v1701_v0 }
 0x23f   :  { %1430 = vmatpush3.bf16.msra.mxu0 %v1819_v56 }
 0x240   :  { %1431 = vmatprep.subr.bf16.mxu0 %v1701_v0 }
 0x243   :  { %1433 = vmatpush3.bf16.msra.mxu0 %v1833_v2 }
 0x244   :  { %1434 = vmatprep.subr.bf16.mxu0 %v1701_v0 }
 0x247   :  { %1436 = vmatpush3.bf16.msra.mxu0 %v1839_v5 }
 0x248   :  { %1437 = vmatprep.subr.bf16.mxu0 %v1701_v0 }
 0x24b   :  { %1439 = vmatpush3.bf16.msra.mxu0 %v1844_v9 }
 0x24c   :  { %1440 = vmatprep.subr.bf16.mxu0 %v1701_v0 }
 0x24f   :  { %1442 = vmatpush3.bf16.msra.mxu0 %v1850_v14 }
 0x250   :  { %1467 = vmatprep.subr.bf16.mxu0 %v1701_v0 }
 0x305   :  { %v394_v1 = vpop.f32.mrb[16].mxu0 }
 0x306   :  { %v398_v3 = vadd.f32 %v394_v1, %v227_v63  ;;  %v1139_v4 = vpop.f32.mrb[17].mxu0  ;;  %v785_v63 = vld [vmem:[#allocation8 + $0xc8] sm:$0xff]  ;;  %v787_v1 = vld [vmem:[#allocation8 + $0xd8] sm:$0xff] }
 0x307   :  { %v1539_v4 = vpack.c.bf16 %v787_v1, %v785_v63 }
 0x308   :  { %1563 = vtanh.f32 %v398_v3  ;;  %v784_v3 = vld [vmem:[#allocation8 + $0xc0] sm:$0xff] }
 0x312   :  { %v1564_v6 = vpop.eup %1563 }
 0x313   :  { %1173 = vmatmul.mubr.f32.vlgmr.msra.gmra.mrb[2].mxu1 %v1564_v6  ;;  %v786_v6 = vld [vmem:[#allocation8 + $0xd0] sm:$0xff] }
 0x314   :  { %1445 = vmatpush3.bf16.msra.mxu1 %v1808_v30  ;;  %1242 = vmatprep.mubr.msk.f32.mxu1 %vm1702_vm0, %v1703_v13 }
 0x315   :  { %1446 = vmatprep.subr.bf16.mxu1 %v1701_v0 }
 0x318   :  { %1448 = vmatpush3.bf16.msra.mxu1 %v1811_v38 }
 0x319   :  { %1449 = vmatprep.subr.bf16.mxu1 %v1701_v0 }
 0x31c   :  { %1451 = vmatpush3.bf16.msra.mxu1 %v1815_v47 }
 0x31d   :  { %1452 = vmatprep.subr.bf16.mxu1 %v1701_v0 }
 0x320   :  { %1454 = vmatpush3.bf16.msra.mxu1 %v1819_v56 }
 0x321   :  { %1455 = vmatprep.subr.bf16.mxu1 %v1701_v0 }
 0x324   :  { %1457 = vmatpush3.bf16.msra.mxu1 %v1833_v2 }
 0x325   :  { %1458 = vmatprep.subr.bf16.mxu1 %v1701_v0 }
 0x328   :  { %1460 = vmatpush3.bf16.msra.mxu1 %v1839_v5 }
 0x329   :  { %1461 = vmatprep.subr.bf16.mxu1 %v1701_v0 }
 0x32c   :  { %1463 = vmatpush3.bf16.msra.mxu1 %v1844_v9 }
 0x32d   :  { %1464 = vmatprep.subr.bf16.mxu1 %v1701_v0 }
 0x330   :  { %1466 = vmatpush3.bf16.msra.mxu1 %v1850_v14 }
 0x331   :  { %1491 = vmatprep.subr.bf16.mxu1 %v1701_v0 }
 0x3e6   :  { %v466_v8 = vpop.f32.mrb[2].mxu1 }
 0x3e7   :  { %v470_v10 = vadd.f32 %v466_v8, %v232_v7  ;;  %v1174_v11 = vpop.f32.mrb[3].mxu1  ;;  %v791_v7 = vld [vmem:[#allocation8 + $0xf8] sm:$0xff]  ;;  %v1541_v8 = vpack.c.bf16 %v786_v6, %v784_v3 }
 0x3e8   :  { %v788_v11 = vld [vmem:[#allocation8 + $0xe0] sm:$0xff] }
 0x3e9   :  { %1565 = vtanh.f32 %v470_v10  ;;  %v1543_v10 = vpack.c.bf16 %v791_v7, %v789_v59 }
 0x3f3   :  { %v1566_v12 = vpop.eup %1565 }
 0x3f4   :  { %1208 = vmatmul.mubr.f32.vlgmr.msra.gmra.mrb[18].mxu0 %v1566_v12  ;;  %v790_v12 = vld [vmem:[#allocation8 + $0xf0] sm:$0xff] }
 0x3f5   :  { %1469 = vmatpush3.bf16.msra.mxu0 %v1808_v30  ;;  %1277 = vmatprep.mubr.msk.f32.mxu0 %vm1702_vm0, %v1703_v13 }
 0x3f6   :  { %1470 = vmatprep.subr.bf16.mxu0 %v1701_v0 }
 0x3f9   :  { %1472 = vmatpush3.bf16.msra.mxu0 %v1811_v38 }
 0x3fa   :  { %1473 = vmatprep.subr.bf16.mxu0 %v1701_v0 }
 0x3fd   :  { %1475 = vmatpush3.bf16.msra.mxu0 %v1815_v47 }
 0x3fe   :  { %1476 = vmatprep.subr.bf16.mxu0 %v1701_v0 }
 0x401   :  { %1478 = vmatpush3.bf16.msra.mxu0 %v1819_v56 }
 0x402   :  { %1479 = vmatprep.subr.bf16.mxu0 %v1701_v0 }
 0x405   :  { %1481 = vmatpush3.bf16.msra.mxu0 %v1833_v2 }
 0x406   :  { %1482 = vmatprep.subr.bf16.mxu0 %v1701_v0 }
 0x409   :  { %1484 = vmatpush3.bf16.msra.mxu0 %v1839_v5 }
 0x40a   :  { %1485 = vmatprep.subr.bf16.mxu0 %v1701_v0 }
 0x40d   :  { %1487 = vmatpush3.bf16.msra.mxu0 %v1844_v9 }
 0x40e   :  { %1488 = vmatprep.subr.bf16.mxu0 %v1701_v0 }
 0x411   :  { %1490 = vmatpush3.bf16.msra.mxu0 %v1850_v14 }
 0x4c7   :  { %v538_v16 = vpop.f32.mrb[18].mxu0 }
 0x4c8   :  { %v542_v17 = vadd.f32 %v538_v16, %v237_v15  ;;  %v1209_v18 = vpop.f32.mrb[19].mxu0  ;;  %v1545_v15 = vpack.c.bf16 %v790_v12, %v788_v11  ;;  %v252_v16 = vadd.f32 %v1910_v62, %v1862_v23 }
 0x4ca   :  { %1567 = vtanh.f32 %v542_v17 }
 0x4d4   :  { %v1568_v19 = vpop.eup %1567 }
 0x4d5   :  { %1243 = vmatmul.mubr.f32.vlgmr.msra.gmra.mrb[4].mxu1 %v1568_v19 }
 0x4d6   :  { %1493 = vmatpush3.bf16.msra.mxu1 %v1808_v30  ;;  %1312 = vmatprep.mubr.msk.f32.mxu1 %vm1702_vm0, %v1703_v13  ;;  %v242_v30 = vadd.f32 %v1906_v55, %v1862_v23  ;;  %v783_v55 = vld [vmem:[#allocation8 + $0xb8] sm:$0xff] }
 0x4d7   :  { %1494 = vmatprep.subr.bf16.mxu1 %v1701_v0  ;;  %v1535_v57 = vpack.c.bf16 %v783_v55, %v781_v54 }
 0x4da   :  { %1496 = vmatpush3.bf16.msra.mxu1 %v1811_v38 }
 0x4db   :  { %1497 = vmatprep.subr.bf16.mxu1 %v1701_v0 }
 0x4de   :  { %1499 = vmatpush3.bf16.msra.mxu1 %v1815_v47 }
 0x4df   :  { %1500 = vmatprep.subr.bf16.mxu1 %v1701_v0 }
 0x4e2   :  { %1502 = vmatpush3.bf16.msra.mxu1 %v1819_v56 }
 0x4e3   :  { %1503 = vmatprep.subr.bf16.mxu1 %v1701_v0 }
 0x4e6   :  { %1505 = vmatpush3.bf16.msra.mxu1 %v1833_v2 }
 0x4e7   :  { %1506 = vmatprep.subr.bf16.mxu1 %v1701_v0 }
 0x4ea   :  { %1508 = vmatpush3.bf16.msra.mxu1 %v1839_v5  ;;  %v761_v5 = vld [vmem:[#allocation8 + $0x8] sm:$0xff] }
 0x4eb   :  { %1509 = vmatprep.subr.bf16.mxu1 %v1701_v0  ;;  %v1515_v22 = vpack.c.bf16 %v763_v20, %v761_v5 }
 0x4ed   :  { %1516 = vmatprep.subr.bf16.mxu0 %v1515_v22 }
 0x4ee   :  { %1511 = vmatpush3.bf16.msra.mxu1 %v1844_v9  ;;  %v762_v9 = vld [vmem:[#allocation8 + $0x10] sm:$0xff] }
 0x4ef   :  { %1512 = vmatprep.subr.bf16.mxu1 %v1701_v0  ;;  %v767_v0 = vld [vmem:[#allocation8 + $0x38] sm:$0xff]  ;;  %v1517_v25 = vpack.c.bf16 %v762_v9, %v760_v21 }
 0x4f2   :  { %1514 = vmatpush3.bf16.msra.mxu1 %v1850_v14  ;;  %v1519_v14 = vpack.c.bf16 %v767_v0, %v765_v24 }
 0x5a8   :  { %v610_v38 = vpop.f32.mrb[4].mxu1 }
 0x5a9   :  { %v614_v47 = vadd.f32 %v610_v38, %v242_v30  ;;  %v1244_v56 = vpop.f32.mrb[5].mxu1  ;;  %v794_v38 = vlaneseq }
 0x5ab   :  { %1569 = vtanh.f32 %v614_v47  ;;  %v795_v47 = vshrl.u32 %v794_v38, 7 }
 0x5ad   :  { %v796_v56 = vsub.s32 0, %v795_v47  ;;  %v800_v5 = vsub.s32 1, %v795_v47 }
 0x5b5   :  { %v1570_v2 = vpop.eup %1569 }
 0x5b6   :  { %1278 = vmatmul.mubr.f32.vlgmr.msra.gmra.mrb[20].mxu0 %v1570_v2  ;;  %v792_v2 = vld [vmem:[%s1995_s5] sm:$0x3] }
 0x5b7   :  { %868 = vmatprep.mubr.f32.mxu0 %v1703_v13  ;;  %1518 = vmatpush1.bf16.msra.mxu0 %v1517_v25  ;;  %v770_v13 = vld [vmem:[#allocation8 + $0x50] sm:$0xff]  ;;  %v797_v20 = vrot.slane %v792_v2, %v796_v56  ;;  %v801_v21 = vrot.slane %v792_v2, %v800_v5 }
 0x5b8   :  { %1520 = vmatprep.subr.bf16.mxu0 %v1519_v14  ;;  %v1525_v36 = vpack.c.bf16 %v770_v13, %v768_v33 }
 0x5bb   :  { %1522 = vmatpush1.bf16.msra.mxu0 %v1521_v31 }
 0x5bc   :  { %1524 = vmatprep.subr.bf16.mxu0 %v1523_v32 }
 0x5bf   :  { %1526 = vmatpush1.bf16.msra.mxu0 %v1525_v36 }
 0x5c0   :  { %1528 = vmatprep.subr.bf16.mxu0 %v1527_v37 }
 0x5c3   :  { %1530 = vmatpush1.bf16.msra.mxu0 %v1529_v43 }
 0x5c4   :  { %1532 = vmatprep.subr.bf16.mxu0 %v1531_v44 }
 0x5c7   :  { %1534 = vmatpush1.bf16.msra.mxu0 %v1533_v48 }
 0x5c8   :  { %1536 = vmatprep.subr.bf16.mxu0 %v1535_v57 }
 0x5cb   :  { %1538 = vmatpush1.bf16.msra.mxu0 %v1537_v61 }
 0x5cc   :  { %1540 = vmatprep.subr.bf16.mxu0 %v1539_v4 }
 0x5cf   :  { %1542 = vmatpush1.bf16.msra.mxu0 %v1541_v8 }
 0x5d0   :  { %1544 = vmatprep.subr.bf16.mxu0 %v1543_v10 }
 0x5d3   :  { %1546 = vmatpush1.bf16.msra.mxu0 %v1545_v15 }
 0x689   :  { %v682_v50 = vpop.f32.mrb[20].mxu0 }
 0x68a   :  { %v686_v51 = vadd.f32 %v682_v50, %v247_v49  ;;  %v1279_v52 = vpop.f32.mrb[21].mxu0 }
 0x68c   :  { %1571 = vtanh.f32 %v686_v51 }
 0x696   :  { %v1572_v53 = vpop.eup %1571 }
 0x697   :  { %1313 = vmatmul.mubr.f32.vlgmr.msra.gmra.mrb[6].mxu1 %v1572_v53 }
 0x76a   :  { %v754_v17 = vpop.f32.mrb[6].mxu1 }
 0x76b   :  { %v758_v18 = vadd.f32 %v754_v17, %v252_v16  ;;  %v1314_v19 = vpop.f32.mrb[7].mxu1 }
 0x76d   :  { %1573 = vtanh.f32 %v758_v18 }
 0x777   :  { %v1574_v30 = vpop.eup %1573 }
 0x778   :  { %869 = vmatmul.mubr.f32.vlgmr.msra.gmra.mrb[22].mxu0 %v1574_v30 }
 0x84b   :  { %v870_v22 = vpop.f32.mrb[22].mxu0 }
 0x84c   :  { %v871_v23 = vadd.f32 %v870_v22, %v797_v20  ;;  %v872_v62 = vpop.f32.mrb[23].mxu0 }
 0x84d   :  { %v873_v9 = vadd.f32 %v872_v62, %v801_v21 }
 0x84e   :  { %875 = vst [vmem:[#allocation10] sm:$0xff] %v871_v23 }
 0x84f   :  { %876 = vst [vmem:[#allocation10 + $0x8] sm:$0xff] %v873_v9 }
 0x850   :  { %1674 = shalt.err (!%p1671_p8)
}
 0x851   :  { %s1675_s27 = scalar_lea.hbm %s1996_s6, 256 }
 0x852   :  { %p1676_p9 = scmp.ne.s32.totalorder %s1996_s6, %s1675_s27  ;;  %p1679_p10 = scmp.lt.u32.totalorder %s1675_s27, %s1996_s6 }
 0x854   :  { %p1681_p11 = pnand %p1679_p10, %p1676_p9 }
 0x856   :  { %1684 = shalt.err (!%p1681_p11)
}
 0x857   :  { %886 = dma.vmem_to_hbm [thread:$0]  %s884_s24, 256, %s1996_s6, [#allocation4]  }
 0x858   :  { %1691 = dma.done.wait [#allocation4], 256  }
 0x859   :  { %1692 = vsyncadd [#allocation4], 4294967040 }
 0x85a   :  { %890 = vsyncpa [#allocation3], 1 }
 0x85b   :  { %891 = vsyncpa [#allocation6], 1 }
 0x85c   :  { %892 = vsyncpa [#allocation9], 1 }
 0x85d   :  { %893 = vsyncpa [#allocation4], 1 }

</bundles_post_ra>
